<compile_context>
chip_gen: v7x
topology: tpu7x:2x2x1
jax: 0.10.0
libtpu: 0.0.40
codegen_flags: <defaults>
</compile_context>

<pallas_src>
import jax
import jax.numpy as jnp
import numpy as np
from jax.experimental import pallas as pl
from jax.experimental.pallas import tpu as pltpu


def _round_up(n, m):
    return (n + m - 1) // m * m


def _interaction_kernel(x_ref, y_ref, wxt_ref, wyt_ref, bias_ref,
                        wblk_ref, rrep_ref, gsum_ref, o_ref):
    x = x_ref[...]                      # (TB, x_dim)  compute dtype (bf16)
    y = y_ref[...]                      # (TB, y_dim)  compute dtype (bf16)

    # Linear terms + combined bias (MXU matmuls, f32 accumulation).
    out = jnp.dot(x, wxt_ref[...], preferred_element_type=jnp.float32)
    out = out + jnp.dot(y, wyt_ref[...], preferred_element_type=jnp.float32)
    out = out + bias_ref[...]

    # Bilinear head interaction, all heads/outputs at once:
    #   tx[b, h*D*hy + o*hy + j] = sum_i x[b, h*hx+i] * W3[h, i, o*hy + j]
    #   ty[b, h*D*hy + o*hy + j] = y[b, h*hy + j]
    #   xy[b, o] = sum_{h,j} tx[b, h*D*hy + o*hy + j] * ty[b, h*D*hy + o*hy + j]
    tx = jnp.dot(x, wblk_ref[...], preferred_element_type=jnp.float32)       # (TB, K)
    ty = jnp.dot(y, rrep_ref[...], preferred_element_type=jnp.float32)       # (TB, K)
    xy = jnp.dot(tx * ty, gsum_ref[...], preferred_element_type=jnp.float32)  # (TB, D)

    o_ref[...] = (out + xy).astype(o_ref.dtype)


def interaction_aggregation(x, y, wx, bx, wy, by, w_xy, *, num_heads,
                            output_dim, block_rows=None,
                            compute_dtype=jnp.bfloat16):
    """Pallas implementation of InteractionAggregation.forward(x, y)."""
    B, x_dim = x.shape
    _, y_dim = y.shape
    H = num_heads
    D = output_dim
    hx = x_dim // H
    hy = y_dim // H
    K = H * D * hy

    in_bytes = jnp.dtype(compute_dtype).itemsize

    # ---- batch tile: largest multiple of 8 keeping the double-buffered
    # working set well under the smallest default scoped-VMEM limit
    # (16 MiB on v5e, 32 MiB on v6e/v7x; v7x physical VMEM is only 64 MiB).
    if block_rows is None:
        budget = 8 * 1024 * 1024
        row_bytes = (x_dim + y_dim) * in_bytes + D * 4
        tb = budget // (2 * row_bytes)
        tb = max(8, min(2048, (tb // 8) * 8))
    else:
        assert block_rows % 8 == 0, "block_rows must be a multiple of 8"
        tb = block_rows
    tb = min(tb, _round_up(B, 8))
    b_pad = _round_up(B, tb)          # pad batch so every block is full
    num_tiles = b_pad // tb

    # ---- activations: bf16 memory-bound streams, padded to tile multiple.
    x_p = x.astype(compute_dtype)
    y_p = y.astype(compute_dtype)
    if b_pad != B:
        x_p = jnp.pad(x_p, ((0, b_pad - B), (0, 0)))
        y_p = jnp.pad(y_p, ((0, b_pad - B), (0, 0)))

    # ---- trace-time constant parameter slabs.
    wxt = wx.T.astype(compute_dtype)                     # (x_dim, D)
    wyt = wy.T.astype(compute_dtype)                     # (y_dim, D)
    bias = (bx + by).reshape(1, D).astype(jnp.float32)   # combined bias

    # W3[h, i, k] with k = o*hy + j  (same flat-buffer view as torch .view()).
    w3 = w_xy.reshape(H, hx, hy * D).astype(jnp.float32)
    eye_h = jnp.eye(H, dtype=jnp.float32)
    eye_hy = jnp.eye(hy, dtype=jnp.float32)
    eye_d = jnp.eye(D, dtype=jnp.float32)
    # Block-diagonal bilinear weight: (x_dim, K).
    wblk = (eye_h[:, None, :, None] * w3[:, :, None, :]
            ).reshape(x_dim, K).astype(compute_dtype)
    # Replication matrix: ty = y @ rrep repeats each y head D times: (y_dim, K).
    rrep = jnp.broadcast_to(
        eye_h[:, None, :, None, None] * eye_hy[None, :, None, None, :],
        (H, hy, H, D, hy)).reshape(y_dim, K).astype(compute_dtype)
    # Per-output summation matrix (kept f32 — multiplies f32 products): (K, D).
    gsum = jnp.broadcast_to(eye_d[None, :, None, :],
                            (H, D, hy, D)).reshape(K, D)

    def batch_spec(feat):
        return pl.BlockSpec((tb, feat), lambda i: (i, 0))

    def const_spec(r, c):
        return pl.BlockSpec((r, c), lambda i: (0, 0))

    weight_bytes = ((wxt.size + wyt.size + wblk.size + rrep.size) * in_bytes
                    + (bias.size + gsum.size) * 4)
    cost = pl.CostEstimate(
        flops=int(2 * b_pad * ((x_dim + y_dim) * (D + K) + K * D) + b_pad * K),
        transcendentals=0,
        bytes_accessed=int(b_pad * ((x_dim + y_dim) * in_bytes + D * 4)
                           + weight_bytes))

    out = pl.pallas_call(
        _interaction_kernel,
        grid=(num_tiles,),
        in_specs=[
            batch_spec(x_dim),        # x
            batch_spec(y_dim),        # y
            const_spec(x_dim, D),     # wxt  (VMEM-resident across grid steps)
            const_spec(y_dim, D),     # wyt
            const_spec(1, D),         # combined bias
            const_spec(x_dim, K),     # block-diagonal bilinear weight
            const_spec(y_dim, K),     # replication matrix
            const_spec(K, D),         # summation matrix
        ],
        out_specs=pl.BlockSpec((tb, D), lambda i: (i, 0)),
        out_shape=jax.ShapeDtypeStruct((b_pad, D), jnp.float32),
        compiler_params=pltpu.CompilerParams(
            dimension_semantics=("parallel",)),
        cost_estimate=cost,
    )(x_p, y_p, wxt, wyt, bias, wblk, rrep, gsum)

    return out[:B]


def reference_forward(x, y, wx, bx, wy, by, w_xy, *, num_heads, output_dim):
    """Pure-JAX mirror of the PyTorch forward (f32, highest precision)."""
    B = x.shape[0]
    hx = x.shape[1] // num_heads
    hy = y.shape[1] // num_heads
    hp = jax.lax.Precision.HIGHEST
    out = (jnp.dot(x, wx.T, precision=hp) + bx
           + jnp.dot(y, wy.T, precision=hp) + by)
    head_x = x.reshape(B, num_heads, hx)
    head_y = y.reshape(B, num_heads, hy)
    W = w_xy.reshape(num_heads, hx, hy * output_dim)
    z = jnp.einsum('bhi,hik->bhk', head_x, W, precision=hp)       # (B,H,hy*D)
    z2 = z.reshape(B, num_heads, output_dim, hy)
    xy = jnp.einsum('bhoj,bhj->bho', z2, head_y, precision=hp)    # (B,H,D)
    return out + xy.sum(axis=1)


if __name__ == "__main__":
    # Small shapes consistent with the module; B deliberately not a multiple
    # of the batch tile so grid + padding are exercised.
    B = 200
    x_dim, y_dim = 32, 16
    num_heads, output_dim = 2, 1
    hx, hy = x_dim // num_heads, y_dim // num_heads

    key = jax.random.PRNGKey(0)
    kx, ky, kwx, kbx, kwy, kby, kxy = jax.random.split(key, 7)

    x = jax.random.normal(kx, (B, x_dim), dtype=jnp.float32)
    y = jax.random.normal(ky, (B, y_dim), dtype=jnp.float32)

    # Deterministic parameter init (shapes from the module __init__).
    wx = jax.random.uniform(kwx, (output_dim, x_dim), jnp.float32,
                            -1.0 / np.sqrt(x_dim), 1.0 / np.sqrt(x_dim))
    bx = jax.random.uniform(kbx, (output_dim,), jnp.float32,
                            -1.0 / np.sqrt(x_dim), 1.0 / np.sqrt(x_dim))
    wy = jax.random.uniform(kwy, (output_dim, y_dim), jnp.float32,
                            -1.0 / np.sqrt(y_dim), 1.0 / np.sqrt(y_dim))
    by = jax.random.uniform(kby, (output_dim,), jnp.float32,
                            -1.0 / np.sqrt(y_dim), 1.0 / np.sqrt(y_dim))
    # xavier_normal_ for w_xy: std = sqrt(2 / (fan_in + fan_out))
    fan_in = num_heads * hx * hy
    xavier_std = np.sqrt(2.0 / (fan_in + output_dim)).astype(np.float32)
    w_xy = xavier_std * jax.random.normal(
        kxy, (num_heads * hx * hy, output_dim), dtype=jnp.float32)

    out = interaction_aggregation(
        x, y, wx, bx, wy, by, w_xy,
        num_heads=num_heads, output_dim=output_dim, block_rows=128)
    out = jax.block_until_ready(out)

    # Reference uses the same bf16 quantization of the activation / matmul
    # weight streams so tolerances stay tight.
    q = lambda a: a.astype(jnp.bfloat16).astype(jnp.float32)
    ref = reference_forward(q(x), q(y), q(wx), bx, q(wy), by, q(w_xy),
                            num_heads=num_heads, output_dim=output_dim)
    ref = jax.block_until_ready(ref)

    np.testing.assert_allclose(np.asarray(out), np.asarray(ref),
                               rtol=2e-3, atol=2e-3)
    print("KERNEL_OK")
</pallas_src>

<mosaic_0001>
module attributes {stable_mosaic.version = 11 : i64} {
  func.func @_interaction_kernel(%arg0: i32, %arg1: memref<128x32xbf16, #tpu.memory_space<vmem>>, %arg2: memref<128x16xbf16, #tpu.memory_space<vmem>>, %arg3: memref<32x1xbf16, #tpu.memory_space<vmem>>, %arg4: memref<16x1xbf16, #tpu.memory_space<vmem>>, %arg5: memref<1x1xf32, #tpu.memory_space<vmem>>, %arg6: memref<32x16xbf16, #tpu.memory_space<vmem>>, %arg7: memref<16x16xbf16, #tpu.memory_space<vmem>>, %arg8: memref<16x1xf32, #tpu.memory_space<vmem>>, %arg9: memref<128x1xf32, #tpu.memory_space<vmem>>) attributes {dimension_semantics = [#tpu.dimension_semantics<parallel>], iteration_bounds = array<i64: 2>, scalar_prefetch = 0 : i64, scratch_operands = 0 : i64, tpu.core_type = #tpu.core_type<tc>, window_params = [{transform_indices = @transform_0, window_bounds = array<i64: 128, 32>}, {transform_indices = @transform_1, window_bounds = array<i64: 128, 16>}, {pipeline_mode = #tpu.pipeline_mode<synchronous>, transform_indices = @transform_2, window_bounds = array<i64: 32, 1>}, {pipeline_mode = #tpu.pipeline_mode<synchronous>, transform_indices = @transform_3, window_bounds = array<i64: 16, 1>}, {pipeline_mode = #tpu.pipeline_mode<synchronous>, transform_indices = @transform_4, window_bounds = array<i64: 1, 1>}, {pipeline_mode = #tpu.pipeline_mode<synchronous>, transform_indices = @transform_5, window_bounds = array<i64: 32, 16>}, {pipeline_mode = #tpu.pipeline_mode<synchronous>, transform_indices = @transform_6, window_bounds = array<i64: 16, 16>}, {pipeline_mode = #tpu.pipeline_mode<synchronous>, transform_indices = @transform_7, window_bounds = array<i64: 16, 1>}, {transform_indices = @transform_8, window_bounds = array<i64: 128, 1>}]} {
    %c0 = arith.constant 0 : index
    %c0_0 = arith.constant 0 : index
    %0 = vector.load %arg1[%c0, %c0_0] : memref<128x32xbf16, #tpu.memory_space<vmem>>, vector<128x32xbf16>
    %c0_1 = arith.constant 0 : index
    %c0_2 = arith.constant 0 : index
    %1 = vector.load %arg2[%c0_1, %c0_2] : memref<128x16xbf16, #tpu.memory_space<vmem>>, vector<128x16xbf16>
    %c0_3 = arith.constant 0 : index
    %c0_4 = arith.constant 0 : index
    %2 = vector.load %arg3[%c0_3, %c0_4] : memref<32x1xbf16, #tpu.memory_space<vmem>>, vector<32x1xbf16>
    %cst = arith.constant dense<0.000000e+00> : vector<128x1xf32>
    %3 = tpu.matmul %0, %2, %cst {dimension_numbers = #tpu.dot_dimension_numbers<[1], [0], [0], [1], [0, 0, 1, 1], [], []>} : vector<128x32xbf16>, vector<32x1xbf16>, vector<128x1xf32> -> vector<128x1xf32>
    %c0_5 = arith.constant 0 : index
    %c0_6 = arith.constant 0 : index
    %4 = vector.load %arg4[%c0_5, %c0_6] : memref<16x1xbf16, #tpu.memory_space<vmem>>, vector<16x1xbf16>
    %cst_7 = arith.constant dense<0.000000e+00> : vector<128x1xf32>
    %5 = tpu.matmul %1, %4, %cst_7 {dimension_numbers = #tpu.dot_dimension_numbers<[1], [0], [0], [1], [0, 0, 1, 1], [], []>} : vector<128x16xbf16>, vector<16x1xbf16>, vector<128x1xf32> -> vector<128x1xf32>
    %6 = arith.addf %3, %5 : vector<128x1xf32>
    %c0_8 = arith.constant 0 : index
    %c0_9 = arith.constant 0 : index
    %7 = vector.load %arg5[%c0_8, %c0_9] : memref<1x1xf32, #tpu.memory_space<vmem>>, vector<1x1xf32>
    %8 = vector.broadcast %7 : vector<1x1xf32> to vector<128x1xf32>
    %9 = arith.addf %6, %8 : vector<128x1xf32>
    %c0_10 = arith.constant 0 : index
    %c0_11 = arith.constant 0 : index
    %10 = vector.load %arg6[%c0_10, %c0_11] : memref<32x16xbf16, #tpu.memory_space<vmem>>, vector<32x16xbf16>
    %cst_12 = arith.constant dense<0.000000e+00> : vector<128x16xf32>
    %11 = tpu.matmul %0, %10, %cst_12 {dimension_numbers = #tpu.dot_dimension_numbers<[1], [0], [0], [1], [0, 0, 1, 1], [], []>} : vector<128x32xbf16>, vector<32x16xbf16>, vector<128x16xf32> -> vector<128x16xf32>
    %c0_13 = arith.constant 0 : index
    %c0_14 = arith.constant 0 : index
    %12 = vector.load %arg7[%c0_13, %c0_14] : memref<16x16xbf16, #tpu.memory_space<vmem>>, vector<16x16xbf16>
    %cst_15 = arith.constant dense<0.000000e+00> : vector<128x16xf32>
    %13 = tpu.matmul %1, %12, %cst_15 {dimension_numbers = #tpu.dot_dimension_numbers<[1], [0], [0], [1], [0, 0, 1, 1], [], []>} : vector<128x16xbf16>, vector<16x16xbf16>, vector<128x16xf32> -> vector<128x16xf32>
    %14 = arith.mulf %11, %13 : vector<128x16xf32>
    %c0_16 = arith.constant 0 : index
    %c0_17 = arith.constant 0 : index
    %15 = vector.load %arg8[%c0_16, %c0_17] : memref<16x1xf32, #tpu.memory_space<vmem>>, vector<16x1xf32>
    %cst_18 = arith.constant dense<0.000000e+00> : vector<128x1xf32>
    %16 = tpu.matmul %14, %15, %cst_18 {dimension_numbers = #tpu.dot_dimension_numbers<[1], [0], [0], [1], [0, 0, 1, 1], [], []>} : vector<128x16xf32>, vector<16x1xf32>, vector<128x1xf32> -> vector<128x1xf32>
    %17 = arith.addf %9, %16 : vector<128x1xf32>
    %c0_19 = arith.constant 0 : index
    %c0_20 = arith.constant 0 : index
    %18 = vector.load %arg9[%c0_19, %c0_20] : memref<128x1xf32, #tpu.memory_space<vmem>>, vector<128x1xf32>
    tpu.vector_store %arg9[%c0_19, %c0_20], %17 {strides = array<i32>} : memref<128x1xf32, #tpu.memory_space<vmem>>, vector<128x1xf32>,
    return
  }
  func.func @transform_0(%arg0: i32) -> (i32, i32) {
    %c0_i32 = arith.constant 0 : i32
    %c0_i32_0 = arith.constant 0 : i32
    return %arg0, %c0_i32 : i32, i32
  }
  func.func @transform_1(%arg0: i32) -> (i32, i32) {
    %c0_i32 = arith.constant 0 : i32
    %c0_i32_0 = arith.constant 0 : i32
    return %arg0, %c0_i32 : i32, i32
  }
  func.func @transform_2(%arg0: i32) -> (i32, i32) {
    %c0_i32 = arith.constant 0 : i32
    %c0_i32_0 = arith.constant 0 : i32
    %c0_i32_1 = arith.constant 0 : i32
    return %c0_i32, %c0_i32_0 : i32, i32
  }
  func.func @transform_3(%arg0: i32) -> (i32, i32) {
    %c0_i32 = arith.constant 0 : i32
    %c0_i32_0 = arith.constant 0 : i32
    %c0_i32_1 = arith.constant 0 : i32
    return %c0_i32, %c0_i32_0 : i32, i32
  }
  func.func @transform_4(%arg0: i32) -> (i32, i32) {
    %c0_i32 = arith.constant 0 : i32
    %c0_i32_0 = arith.constant 0 : i32
    %c0_i32_1 = arith.constant 0 : i32
    return %c0_i32, %c0_i32_0 : i32, i32
  }
  func.func @transform_5(%arg0: i32) -> (i32, i32) {
    %c0_i32 = arith.constant 0 : i32
    %c0_i32_0 = arith.constant 0 : i32
    %c0_i32_1 = arith.constant 0 : i32
    return %c0_i32, %c0_i32_0 : i32, i32
  }
  func.func @transform_6(%arg0: i32) -> (i32, i32) {
    %c0_i32 = arith.constant 0 : i32
    %c0_i32_0 = arith.constant 0 : i32
    %c0_i32_1 = arith.constant 0 : i32
    return %c0_i32, %c0_i32_0 : i32, i32
  }
  func.func @transform_7(%arg0: i32) -> (i32, i32) {
    %c0_i32 = arith.constant 0 : i32
    %c0_i32_0 = arith.constant 0 : i32
    %c0_i32_1 = arith.constant 0 : i32
    return %c0_i32, %c0_i32_0 : i32, i32
  }
  func.func @transform_8(%arg0: i32) -> (i32, i32) {
    %c0_i32 = arith.constant 0 : i32
    %c0_i32_0 = arith.constant 0 : i32
    return %arg0, %c0_i32 : i32, i32
  }
}

</mosaic_0001>

<bundles_post_ra>
// kernel: tpu_custom_call.1
= control target key start
LH: loop header
LB: loop body
LE: loop exit
PB: predicated region body
PF: predicated region fallthrough
CT: control target
= control target key end

     0   :  { %s1619_s29 = smov 0   ;;  %s1807_s0 = inlined_call_operand.vmem [shape: bf16[256,32], index: 0, kind: input, shape index: {}]   ;;  %s1808_s1 = inlined_call_operand.vmem [shape: bf16[256,16], index: 1, kind: input, shape index: {}]   ;;  %s1809_s2 = inlined_call_operand.vmem [shape: bf16[32,1], index: 2, kind: input, shape index: {}]   ;;  %s1810_s3 = inlined_call_operand.vmem [shape: bf16[16,1], index: 3, kind: input, shape index: {}]   ;;  %s1811_s4 = inlined_call_operand.<no memory space> [shape: f32[1,1], index: 4, kind: input, shape index: {}]   ;;  %s1812_s5 = inlined_call_operand.vmem [shape: bf16[32,16], index: 5, kind: input, shape index: {}]   ;;  %s1813_s6 = inlined_call_operand.vmem [shape: bf16[16,16], index: 6, kind: input, shape index: {}]   ;;  %s1814_s7 = inlined_call_operand.vmem [shape: f32[16,1], index: 7, kind: input, shape index: {}]   ;;  %s1815_s8 = inlined_call_operand.vmem [shape: f32[256,1], index: 8, kind: output, shape index: {}]  }
   0x1   :  { %v13_v0 = vstv %s1811_s4 }
   0x2   :  { %14 = vst [vmem:[#allocation2] sm:$0x1] %v13_v0 }
   0x3 LB: > { %s1267_s30 = sadd.s32 4294967295, %s1569_s29   ;;  %p1271_p0 = scmp.ge.s32.totalorder %s1569_s29, 1  ;;  %s1569_s29 = sphi %s1619_s29, %s20_s29  }
   0x4   : > { %p276_p1 = scmp.lt.s32.totalorder %s1569_s29, 3 }
   0x6   : > { %p277_p2 = pnand %p1271_p0, %p276_p1 }
   0x7   : > { %v1541_v1 = vld [vmem:[%s1810_s3] sm:$0xff] (!%p277_p2)   ;;  %s1272_s4 = sshll.u32 (!%p277_p2), %s1267_s30, 4  ;;  %vm418_vm0 = vcmask (!%p277_p2), 130048   ;;  %v1549_v6 = vld [vmem:[%s1812_s5 + $0x8] sm:$0xff] (!%p277_p2)   ;;  %vm592_vm1 = vcmask (!%p277_p2), 261120   ;;  %vm1182_vm2 = vcmask (!%p277_p2), 7168  }
   0x8   : > { %280 = sbr.rel (%p277_p2) target bundleno = 530 (0x212), region = 52  ;;  %p316_p3 = scmp.lt.s32.totalorder (!%p277_p2), %s1272_s4, 31  ;;  %1515 = vmatprep.subr.bf16.mxu1 (!%p277_p2), %v1541_v1  ;;  %1407 = vmatprep.subr.bf16.mxu0 (!%p277_p2), %v1541_v1  ;;  %v1544_v2 = vld [vmem:[%s1812_s5] sm:$0xff] (!%p277_p2)   ;;  %v1553_v8 = vld [vmem:[%s1809_s2 + $0x8] sm:$0xff] (!%p277_p2)  }
   0x9   : > { %1516 = vmatpush3.bf16.msra.mxu1 (!%p277_p2), %v1541_v1  ;;  %1408 = vmatpush3.bf16.msra.mxu0 (!%p277_p2), %v1541_v1  ;;  %v1552_v3 = vld [vmem:[%s1809_s2] sm:$0xff] (!%p277_p2)   ;;  %v972_v24 = vld [vmem:[%s1814_s7 + $0x8] sm:$0xff] (!%p277_p2) }
   0xa   : > { %1445 = vmatprep.subr.bf16.mxu1 (!%p277_p2), %v1544_v2  ;;  %1425 = vmatprep.subr.bf16.mxu0 (!%p277_p2), %v1552_v3  ;;  %v1555_v12 = vld [vmem:[%s1813_s6] sm:$0xff] (!%p277_p2)  }
   0xb   : > { %v971_v23 = vld [vmem:[%s1814_s7] sm:$0xff] (!%p277_p2) }
   0xc   : > { %v1511_v25 = vpack.c.bf16 (!%p277_p2), %v972_v24, %v971_v23 }
   0xf   : > { %s1817_s4 = smov (!%p316_p3, %s1272_s4), 31 }
  0x10   : > { %s1273_s15 = sshll.u32 %s1817_s4, 2  ;;  %s1277_s11 = sshll.u32 %s1817_s4, 3 }
  0x11   : > { %s325_s18 = scalar_lea.vmem %s1808_s1, %s1273_s15  ;;  %s1655_s25 = scalar_lea.vmem %s1807_s0, %s1273_s15 }
  0x12   : > { %v1542_v4 = vld [vmem:[%s325_s18] sm:$0xff]   ;;  %v1545_v7 = vld [vmem:[%s325_s18 + $0x8] sm:$0xff]   ;;  %v1547_v10 = vld [vmem:[%s325_s18 + $0x10] sm:$0xff]   ;;  %s1756_s14 = scalar_lea.vmem %s1815_s8, %s1277_s11 }
  0x13   : > { %v1543_v5 = vld [vmem:[%s325_s18 + $0x20] sm:$0xff]   ;;  %1409 = vmatprep.mubr.msk.bf16.mxu0 %vm418_vm0, %v1542_v4  ;;  %v1546_v9 = vld [vmem:[%s325_s18 + $0x28] sm:$0xff]   ;;  %v1548_v11 = vld [vmem:[%s325_s18 + $0x30] sm:$0xff]  }
  0x14   : > { %1417 = vmatprep.mubr.msk.bf16.mxu1 %vm418_vm0, %v1543_v5  ;;  %1410 = vmatmul.mubr.msk.bf16.vlgmr.msra.gmra.mrb[0].mxu0 %vm418_vm0, %v1545_v7  ;;  %v1550_v13 = vld [vmem:[%s325_s18 + $0x18] sm:$0xff]   ;;  %v1554_v15 = vld [vmem:[%s1655_s25] sm:$0xff]   ;;  %v1556_v16 = vld [vmem:[%s1655_s25 + $0x8] sm:$0xff]  }
  0x15   : > { %1418 = vmatmul.mubr.msk.bf16.vlgmr.msra.gmra.mrb[0].mxu1 %vm418_vm0, %v1546_v9  ;;  %1426 = vmatpush3.bf16.msra.mxu0 %v1552_v3  ;;  %v1551_v14 = vld [vmem:[%s325_s18 + $0x38] sm:$0xff]   ;;  %v1557_v17 = vld [vmem:[%s1655_s25 + $0x10] sm:$0xff]   ;;  %v1559_v19 = vld [vmem:[%s1655_s25 + $0x20] sm:$0xff]  }
  0x16   : > { %1446 = vmatpush3.bf16.msra.mxu1 %v1544_v2  ;;  %1413 = vmatprep.mubr.msk.bf16.mxu0 %vm418_vm0, %v1547_v10  ;;  %v1558_v18 = vld [vmem:[%s1655_s25 + $0x18] sm:$0xff]   ;;  %v1560_v20 = vld [vmem:[%s1655_s25 + $0x28] sm:$0xff]   ;;  %v1561_v21 = vld [vmem:[%s1655_s25 + $0x30] sm:$0xff]  }
  0x17   : > { %1421 = vmatprep.mubr.msk.bf16.mxu1 %vm418_vm0, %v1548_v11  ;;  %1447 = vmatprep.subr.bf16.mxu1 %v1549_v6  ;;  %v1562_v22 = vld [vmem:[%s1655_s25 + $0x38] sm:$0xff]  }
  0x18   : > { %1427 = vmatprep.subr.bf16.mxu0 %v1553_v8 }
  0x19   : > { %1428 = vmatpush3.bf16.msra.mxu0 %v1553_v8 }
  0x1a   : > { %1448 = vmatpush3.bf16.msra.mxu1 %v1549_v6  ;;  %1512 = vmatprep.subr.bf16.mxu0 %v1511_v25 }
  0x1b   : > { %1465 = vmatprep.subr.bf16.mxu1 %v1555_v12 }
  0x1c   : > { %1414 = vmatmul.mubr.msk.bf16.gmra.mrb[4].mxu0 %vm418_vm0, %v1550_v13 }
  0x1d   : > { %1422 = vmatmul.mubr.msk.bf16.gmra.mrb[4].mxu1 %vm418_vm0, %v1551_v14  ;;  %1429 = vmatprep.mubr.msk.bf16.mxu0 %vm592_vm1, %v1554_v15 }
  0x1e   : > { %1449 = vmatprep.mubr.msk.bf16.mxu1 %vm592_vm1, %v1554_v15 }
  0x24   : > { %1430 = vmatmul.mubr.msk.bf16.vlgmr.msra.gmra.mrb[0].mxu0 %vm592_vm1, %v1556_v16 }
  0x25   : > { %1450 = vmatmul.mubr.msk.bf16.vlgmr.msra.gmra.mrb[8].mxu1 %vm592_vm1, %v1556_v16  ;;  %1433 = vmatprep.mubr.msk.bf16.mxu0 %vm592_vm1, %v1557_v17 }
  0x26   : > { %1466 = vmatpush3.bf16.msra.mxu1 %v1555_v12  ;;  %1453 = vmatprep.mubr.msk.bf16.mxu1 %vm592_vm1, %v1557_v17 }
  0x27   : > { %1514 = vmatpush3.bf16.msra.mxu0 %v1511_v25 }
  0x2c   : > { %1434 = vmatmul.mubr.msk.bf16.gmra.mrb[4].mxu0 %vm592_vm1, %v1558_v18 }
  0x2d   : > { %1454 = vmatmul.mubr.msk.bf16.gmra.mrb[12].mxu1 %vm592_vm1, %v1558_v18  ;;  %1437 = vmatprep.mubr.msk.bf16.mxu0 %vm592_vm1, %v1559_v19 }
  0x2e   : > { %1457 = vmatprep.mubr.msk.bf16.mxu1 %vm592_vm1, %v1559_v19 }
  0x34   : > { %1438 = vmatmul.mubr.msk.bf16.gmra.mrb[8].mxu0 %vm592_vm1, %v1560_v20 }
  0x35   : > { %1458 = vmatmul.mubr.msk.bf16.gmra.mrb[16].mxu1 %vm592_vm1, %v1560_v20  ;;  %1441 = vmatprep.mubr.msk.bf16.mxu0 %vm592_vm1, %v1561_v21 }
  0x36   : > { %1461 = vmatprep.mubr.msk.bf16.mxu1 %vm592_vm1, %v1561_v21 }
  0x3c   : > { %1442 = vmatmul.mubr.msk.bf16.gmra.mrb[12].mxu0 %vm592_vm1, %v1562_v22 }
  0x3d   : > { %1462 = vmatmul.mubr.msk.bf16.gmra.mrb[20].mxu1 %vm592_vm1, %v1562_v22 }
  0x3e   : > { %1467 = vmatprep.mubr.msk.bf16.mxu1 %vm418_vm0, %v1542_v4 }
  0x45   : > { %1468 = vmatmul.mubr.msk.bf16.vlgmr.msra.gmra.mrb[24].mxu1 %vm418_vm0, %v1545_v7 }
  0x46   : > { %1471 = vmatprep.mubr.msk.bf16.mxu1 %vm418_vm0, %v1547_v10 }
  0x4d   : > { %1472 = vmatmul.mubr.msk.bf16.gmra.mrb[28].mxu1 %vm418_vm0, %v1550_v13 }
  0x4e   : > { %1475 = vmatprep.mubr.msk.bf16.mxu1 %vm418_vm0, %v1543_v5 }
  0x55   : > { %1476 = vmatmul.mubr.msk.bf16.gmra.mrb[32].mxu1 %vm418_vm0, %v1546_v9 }
  0x56   : > { %1479 = vmatprep.mubr.msk.bf16.mxu1 %vm418_vm0, %v1548_v11 }
  0x5d   : > { %1480 = vmatmul.mubr.msk.bf16.gmra.mrb[36].mxu1 %vm418_vm0, %v1551_v14 }
  0xe8   : > { %v1419_v26 = vpop.f32.mrb[0].mxu1 }
  0xe9   : > { %v509_v27 = vpop.f32.mrb[1].mxu1 }
  0xea   : > { %v1420_v28 = vpop.f32.mrb[2].mxu1 }
  0xeb   : > { %v512_v29 = vpop.f32.mrb[3].mxu1 }
  0xf0   : > { %v1423_v30 = vpop.f32.mrb[4].mxu1 }
  0xf1   : > { %v525_v31 = vpop.f32.mrb[5].mxu1 }
  0xf2   : > { %v1424_v32 = vpop.f32.mrb[6].mxu1 }
  0xf3   : > { %v528_v33 = vpop.f32.mrb[7].mxu1 }
  0xf7   : > { %v1702_v34 = vpop.f32.mrb[0].mxu0 }
  0xf8   : > { %v1451_v35 = vpop.f32.mrb[8].mxu1  ;;  %v1704_v36 = vpop.f32.mrb[1].mxu0 }
  0xf9   : > { %v787_v37 = vpop.f32.mrb[9].mxu1  ;;  %v1706_v38 = vpop.f32.mrb[2].mxu0 }
  0xfa   : > { %v1452_v39 = vpop.f32.mrb[10].mxu1  ;;  %v1708_v40 = vpop.f32.mrb[3].mxu0 }
  0xfb   : > { %v790_v41 = vpop.f32.mrb[11].mxu1 }
  0xff   : > { %v1710_v42 = vpop.f32.mrb[4].mxu0 }
 0x100   : > { %v1455_v43 = vpop.f32.mrb[12].mxu1  ;;  %v1712_v44 = vpop.f32.mrb[5].mxu0 }
 0x101   : > { %v803_v45 = vpop.f32.mrb[13].mxu1  ;;  %v1714_v46 = vpop.f32.mrb[6].mxu0 }
 0x102   : > { %v1456_v47 = vpop.f32.mrb[14].mxu1  ;;  %v1716_v48 = vpop.f32.mrb[7].mxu0 }
 0x103   : > { %v806_v49 = vpop.f32.mrb[15].mxu1 }
 0x107   : > { %v1439_v50 = vpop.f32.mrb[8].mxu0 }
 0x108   : > { %v1718_v51 = vadd.f32 %v1439_v50, %v1419_v26  ;;  %v1459_v52 = vpop.f32.mrb[16].mxu1  ;;  %v683_v53 = vpop.f32.mrb[9].mxu0  ;;  %v1313_v50 = vld [vmem:[#allocation2] ss:$0 sm:$0xff] }
 0x109   : > { %v1720_v54 = vadd.f32 %v683_v53, %v509_v27  ;;  %v819_v55 = vpop.f32.mrb[17].mxu1  ;;  %v1440_v56 = vpop.f32.mrb[10].mxu0  ;;  %v721_v53 = vadd.f32 %v1313_v50, %v1704_v36  ;;  %v723_v36 = vadd.f32 %v1702_v34, %v1313_v50 }
 0x10a   : > { %v1722_v57 = vadd.f32 %v1440_v56, %v1420_v28  ;;  %v1460_v58 = vpop.f32.mrb[18].mxu1  ;;  %v686_v59 = vpop.f32.mrb[11].mxu0 }
 0x10b   : > { %v1724_v60 = vadd.f32 %v686_v59, %v512_v29  ;;  %v822_v61 = vpop.f32.mrb[19].mxu1 }
 0x10f   : > { %v1443_v62 = vpop.f32.mrb[12].mxu0 }
 0x110   : > { %v1726_v63 = vadd.f32 %v1443_v62, %v1423_v30  ;;  %v1463_v0 = vpop.f32.mrb[20].mxu1  ;;  %v699_v1 = vpop.f32.mrb[13].mxu0 }
 0x111   : > { %v1728_v2 = vadd.f32 %v699_v1, %v525_v31  ;;  %v835_v3 = vpop.f32.mrb[21].mxu1  ;;  %v1444_v4 = vpop.f32.mrb[14].mxu0 }
 0x112   : > { %v1730_v5 = vadd.f32 %v1444_v4, %v1424_v32  ;;  %v1464_v6 = vpop.f32.mrb[22].mxu1  ;;  %v702_v7 = vpop.f32.mrb[15].mxu0  ;;  %v725_v4 = vadd.f32 %v1313_v50, %v1712_v44 }
 0x113   : > { %v1732_v8 = vadd.f32 %v702_v7, %v528_v33  ;;  %v838_v9 = vpop.f32.mrb[23].mxu1 }
 0x118   : > { %v1469_v10 = vpop.f32.mrb[24].mxu1 }
 0x119   : > { %v957_v11 = vmul.f32 %v1469_v10, %v1451_v35  ;;  %v892_v12 = vpop.f32.mrb[25].mxu1  ;;  %v727_v10 = vadd.f32 %v1710_v42, %v1313_v50 }
 0x11a   : > { %v955_v13 = vmul.f32 %v892_v12, %v787_v37  ;;  %v1470_v14 = vpop.f32.mrb[26].mxu1 }
 0x11b   : > { %v958_v15 = vmul.f32 %v1470_v14, %v1452_v39  ;;  %v895_v16 = vpop.f32.mrb[27].mxu1  ;;  %v729_v14 = vadd.f32 %v1313_v50, %v1720_v54  ;;  %v734_v54 = vadd.f32 %v1313_v50, %v1732_v8 }
 0x11c   : > { %v956_v17 = vmul.f32 %v895_v16, %v790_v41  ;;  %1487 = vmatprep.mubr.msk.f32.mxu0 %vm418_vm0, %v955_v13  ;;  %v730_v13 = vadd.f32 %v1313_v50, %v1724_v60  ;;  %v731_v60 = vadd.f32 %v1313_v50, %v1718_v51  ;;  %v736_v51 = vadd.f32 %v1313_v50, %v1730_v5 }
 0x11e   : > { %1488 = vmatmul.mubr.msk.f32.vlgmr.msra.gmra.mrb[16].mxu0 %vm418_vm0, %v956_v17  ;;  %v732_v17 = vadd.f32 %v1313_v50, %v1722_v57  ;;  %v733_v57 = vadd.f32 %v1313_v50, %v1728_v2 }
 0x11f   : > { %1490 = vmatprep.mubr.msk.f32.mxu0 %vm418_vm0, %v957_v11 }
 0x120   : > { %v1473_v18 = vpop.f32.mrb[28].mxu1 }
 0x121   : > { %v961_v19 = vmul.f32 %v1473_v18, %v1455_v43  ;;  %v908_v20 = vpop.f32.mrb[29].mxu1 }
 0x122   : > { %v959_v21 = vmul.f32 %v908_v20, %v803_v45  ;;  %v1474_v22 = vpop.f32.mrb[30].mxu1  ;;  %1491 = vmatmul.mubr.msk.f32.gmra.mrb[18].mxu0 %vm418_vm0, %v958_v15 }
 0x123   : > { %v962_v23 = vmul.f32 %v1474_v22, %v1456_v47  ;;  %v911_v24 = vpop.f32.mrb[31].mxu1 }
 0x124   : > { %v960_v25 = vmul.f32 %v911_v24, %v806_v49  ;;  %1493 = vmatprep.mubr.msk.f32.mxu0 %vm418_vm0, %v959_v21 }
 0x126   : > { %1494 = vmatmul.mubr.msk.f32.gmra.mrb[20].mxu0 %vm418_vm0, %v960_v25 }
 0x127   : > { %1496 = vmatprep.mubr.msk.f32.mxu0 %vm418_vm0, %v961_v19 }
 0x128   : > { %v1477_v26 = vpop.f32.mrb[32].mxu1 }
 0x129   : > { %v965_v27 = vmul.f32 %v1477_v26, %v1459_v52  ;;  %v924_v28 = vpop.f32.mrb[33].mxu1  ;;  %v722_v52 = vadd.f32 %v1313_v50, %v1708_v40 }
 0x12a   : > { %v963_v29 = vmul.f32 %v924_v28, %v819_v55  ;;  %v1478_v30 = vpop.f32.mrb[34].mxu1  ;;  %1497 = vmatmul.mubr.msk.f32.gmra.mrb[22].mxu0 %vm418_vm0, %v962_v23 }
 0x12b   : > { %v966_v31 = vmul.f32 %v1478_v30, %v1460_v58  ;;  %v927_v32 = vpop.f32.mrb[35].mxu1 }
 0x12c   : > { %v964_v33 = vmul.f32 %v927_v32, %v822_v61  ;;  %1499 = vmatprep.mubr.msk.f32.mxu0 %vm418_vm0, %v963_v29  ;;  %v724_v61 = vadd.f32 %v1706_v38, %v1313_v50 }
 0x12e   : > { %1500 = vmatmul.mubr.msk.f32.gmra.mrb[24].mxu0 %vm418_vm0, %v964_v33 }
 0x12f   : > { %1502 = vmatprep.mubr.msk.f32.mxu0 %vm418_vm0, %v965_v27  ;;  %v735_v27 = vadd.f32 %v1313_v50, %v1726_v63 }
 0x130   : > { %v1481_v35 = vpop.f32.mrb[36].mxu1 }
 0x131   : > { %v969_v37 = vmul.f32 %v1481_v35, %v1463_v0  ;;  %v940_v39 = vpop.f32.mrb[37].mxu1 }
 0x132   : > { %v967_v41 = vmul.f32 %v940_v39, %v835_v3  ;;  %v1482_v43 = vpop.f32.mrb[38].mxu1  ;;  %1503 = vmatmul.mubr.msk.f32.gmra.mrb[26].mxu0 %vm418_vm0, %v966_v31  ;;  %v726_v3 = vadd.f32 %v1313_v50, %v1716_v48 }
 0x133   : > { %v970_v45 = vmul.f32 %v1482_v43, %v1464_v6  ;;  %v943_v47 = vpop.f32.mrb[39].mxu1 }
 0x134   : > { %v968_v49 = vmul.f32 %v943_v47, %v838_v9  ;;  %1505 = vmatprep.mubr.msk.f32.mxu0 %vm418_vm0, %v967_v41  ;;  %v728_v9 = vadd.f32 %v1714_v46, %v1313_v50 }
 0x136   : > { %1506 = vmatmul.mubr.msk.f32.gmra.mrb[28].mxu0 %vm418_vm0, %v968_v49 }
 0x137   : > { %1508 = vmatprep.mubr.msk.f32.mxu0 %vm418_vm0, %v969_v37 }
 0x13a   : > { %1509 = vmatmul.mubr.msk.f32.gmra.mrb[30].mxu0 %vm418_vm0, %v970_v45 }
 0x1f1   : > { %v1489_v55 = vpop.f32.mrb[16].mxu0 }
 0x1f2   : > { %v1167_v56 = vadd.f32 %v1489_v55, %v722_v52  ;;  %v1087_v58 = vpop.f32.mrb[17].mxu0 }
 0x1f3   : > { %v1166_v59 = vadd.f32 %v1087_v58, %v721_v53 }
 0x1f4   : > { %1184 = vst.msk [vmem:[%s1756_s14 + $0x8] sm:$0xff] %vm1182_vm2, %v1167_v56 }
 0x1f5   : > { %1183 = vst.msk [vmem:[%s1756_s14] sm:$0xff] %vm1182_vm2, %v1166_v59  ;;  %v1492_v40 = vpop.f32.mrb[18].mxu0 }
 0x1f6   : > { %v1169_v62 = vadd.f32 %v1492_v40, %v724_v61  ;;  %v1097_v0 = vpop.f32.mrb[19].mxu0 }
 0x1f7   : > { %v1168_v1 = vadd.f32 %v1097_v0, %v723_v36 }
 0x1f8   : > { %1186 = vst.msk [vmem:[%s1756_s14 + $0x18] sm:$0xff] %vm1182_vm2, %v1169_v62 }
 0x1f9   : > { %1185 = vst.msk [vmem:[%s1756_s14 + $0x10] sm:$0xff] %vm1182_vm2, %v1168_v1  ;;  %v1495_v38 = vpop.f32.mrb[20].mxu0 }
 0x1fa   : > { %v1171_v6 = vadd.f32 %v1495_v38, %v726_v3  ;;  %v1107_v34 = vpop.f32.mrb[21].mxu0 }
 0x1fb   : > { %v1170_v7 = vadd.f32 %v1107_v34, %v725_v4 }
 0x1fc   : > { %1188 = vst.msk [vmem:[%s1756_s14 + $0x28] sm:$0xff] %vm1182_vm2, %v1171_v6 }
 0x1fd   : > { %1187 = vst.msk [vmem:[%s1756_s14 + $0x20] sm:$0xff] %vm1182_vm2, %v1170_v7  ;;  %v1498_v48 = vpop.f32.mrb[22].mxu0 }
 0x1fe   : > { %v1173_v11 = vadd.f32 %v1498_v48, %v728_v9  ;;  %v1117_v44 = vpop.f32.mrb[23].mxu0 }
 0x1ff   : > { %v1172_v12 = vadd.f32 %v1117_v44, %v727_v10 }
 0x200   : > { %1190 = vst.msk [vmem:[%s1756_s14 + $0x38] sm:$0xff] %vm1182_vm2, %v1173_v11 }
 0x201   : > { %1189 = vst.msk [vmem:[%s1756_s14 + $0x30] sm:$0xff] %vm1182_vm2, %v1172_v12  ;;  %v1501_v46 = vpop.f32.mrb[24].mxu0 }
 0x202   : > { %v1175_v15 = vadd.f32 %v1501_v46, %v730_v13  ;;  %v1127_v42 = vpop.f32.mrb[25].mxu0 }
 0x203   : > { %v1174_v16 = vadd.f32 %v1127_v42, %v729_v14 }
 0x204   : > { %1192 = vst.msk [vmem:[%s1756_s14 + $0x48] sm:$0xff] %vm1182_vm2, %v1175_v15 }
 0x205   : > { %1191 = vst.msk [vmem:[%s1756_s14 + $0x40] sm:$0xff] %vm1182_vm2, %v1174_v16  ;;  %v1504_v18 = vpop.f32.mrb[26].mxu0 }
 0x206   : > { %v1177_v19 = vadd.f32 %v1504_v18, %v732_v17  ;;  %v1137_v20 = vpop.f32.mrb[27].mxu0 }
 0x207   : > { %v1176_v21 = vadd.f32 %v1137_v20, %v731_v60 }
 0x208   : > { %1194 = vst.msk [vmem:[%s1756_s14 + $0x58] sm:$0xff] %vm1182_vm2, %v1177_v19 }
 0x209   : > { %1193 = vst.msk [vmem:[%s1756_s14 + $0x50] sm:$0xff] %vm1182_vm2, %v1176_v21  ;;  %v1507_v22 = vpop.f32.mrb[28].mxu0 }
 0x20a   : > { %v1179_v23 = vadd.f32 %v1507_v22, %v734_v54  ;;  %v1147_v24 = vpop.f32.mrb[29].mxu0 }
 0x20b   : > { %v1178_v25 = vadd.f32 %v1147_v24, %v733_v57 }
 0x20c   : > { %1196 = vst.msk [vmem:[%s1756_s14 + $0x68] sm:$0xff] %vm1182_vm2, %v1179_v23 }
 0x20d   : > { %1195 = vst.msk [vmem:[%s1756_s14 + $0x60] sm:$0xff] %vm1182_vm2, %v1178_v25  ;;  %v1510_v26 = vpop.f32.mrb[30].mxu0 }
 0x20e   : > { %v1181_v28 = vadd.f32 %v1510_v26, %v736_v51  ;;  %v1157_v8 = vpop.f32.mrb[31].mxu0 }
 0x20f   : > { %v1180_v29 = vadd.f32 %v1157_v8, %v735_v27 }
 0x210   : > { %1198 = vst.msk [vmem:[%s1756_s14 + $0x78] sm:$0xff] %vm1182_vm2, %v1181_v28 }
 0x211   : > { %1197 = vst.msk [vmem:[%s1756_s14 + $0x70] sm:$0xff] %vm1182_vm2, %v1180_v29 }
 0x212 PF: > { %s20_s29 = sadd.s32 1, %s1569_s29  }
 0x213   : > { %p17_p4 = scmp.ge.s32.totalorder %s20_s29, 4  }
 0x215   :  { %19 = sbr.rel (!%p17_p4) target bundleno = 3 (0x3), region = 85 }

</bundles_post_ra>
